<compile_context>
chip_gen: v7x
topology: tpu7x:2x2x1
jax: 0.10.0
libtpu: 0.0.40
codegen_flags: <defaults>
</compile_context>

<pallas_src>
import functools
import math

import jax
import jax.numpy as jnp
from jax.experimental import pallas as pl
from jax.experimental.pallas import tpu as pltpu


# ----------------------------- kernels -------------------------------------


def adapter_kernel_direct(x_ref, wd_ref, bd_ref, wu_ref, bu_ref, o_ref):
    """Full-I path (no reduction tiling): relu(x @ Wd + bd) @ Wu + bu."""
    x = x_ref[...].astype(wd_ref.dtype)                       # cast in-kernel (VPU)
    h = jnp.dot(x, wd_ref[...],
                preferred_element_type=jnp.float32)           # (tm, I) MXU, f32 acc
    h = jnp.maximum(h + bd_ref[...], 0.0)                     # bias + ReLU in f32
    y = jnp.dot(h.astype(wu_ref.dtype), wu_ref[...],
                preferred_element_type=jnp.float32)           # (tm, H) MXU, f32 acc
    o_ref[...] = (y + bu_ref[...]).astype(o_ref.dtype)        # single store pass


def adapter_kernel_acc(x_ref, wd_ref, bd_ref, wu_ref, bu_ref, o_ref, acc_ref):
    """Reduction-tiled path over I: exact because ReLU is elementwise over I."""
    k = pl.program_id(1)

    x = x_ref[...].astype(wd_ref.dtype)
    h = jnp.dot(x, wd_ref[...], preferred_element_type=jnp.float32)
    h = jnp.maximum(h + bd_ref[...], 0.0)
    y = jnp.dot(h.astype(wu_ref.dtype), wu_ref[...],
                preferred_element_type=jnp.float32)

    @pl.when(k == 0)
    def _init():
        acc_ref[...] = y          # first partial product: no zero-fill store

    @pl.when(k != 0)
    def _accumulate():
        acc_ref[...] += y

    @pl.when(k == pl.num_programs(1) - 1)
    def _finalize():
        o_ref[...] = (acc_ref[...] + bu_ref[...]).astype(o_ref.dtype)


# ----------------------------- wrapper --------------------------------------


def _round_up(a, b):
    return ((a + b - 1) // b) * b


def _cdiv(a, b):
    return (a + b - 1) // b


def _vmem_capacity_bytes():
    try:
        return int(pltpu.get_tpu_info().vmem_capacity_bytes)
    except Exception:
        return 64 << 20  # conservative (v7x per-TC) fallback


def _working_set_bytes(tm, ti, H, itm_x, itm_w, multi_k):
    """VMEM working-set estimate, incl. internal staging of h and casts."""
    wbuf = 2 if multi_k else 1          # weight tiles: double-buffered only if tiled
    ws = 2 * tm * H * itm_x             # x tiles (double-buffered)
    ws += 2 * tm * H * itm_x            # out tiles (double-buffered)
    ws += wbuf * 2 * H * ti * itm_w     # W_down + W_up tiles
    ws += 2 * 4 * (ti + H)              # biases (f32)
    ws += tm * H * itm_w                # in-kernel cast copy of x tile
    ws += tm * ti * (4 + itm_w)         # f32 intermediate h + its cast copy
    ws += tm * H * 4                    # f32 result of second matmul
    if multi_k:
        ws += tm * H * 4                # f32 accumulator scratch
    return ws


def _pick_tm(M, tm_req, min_parallel=2):
    """Balanced, 8-aligned row tile; >=2 tiles when possible (v7x megacore)."""
    if M <= 8:
        return M, 1
    n_i = max(_cdiv(M, tm_req), min_parallel)
    n_i = min(n_i, _cdiv(M, 8))
    tm = _round_up(_cdiv(M, n_i), 8)
    n_i = _cdiv(M, tm)
    return tm, n_i


def _pick_ti(tm, H, I, itm_x, itm_w, budget, ti_req):
    if ti_req is not None:
        if ti_req >= I:
            return I
        if I % ti_req != 0 or ti_req % 128 != 0:
            raise ValueError(
                "ti must divide I exactly and be a multiple of 128 "
                "(multiples of 256 preferred on v6e/v7x)")
        return ti_req
    # Prefer no reduction tiling if the full working set fits the budget.
    if _working_set_bytes(tm, I, H, itm_x, itm_w, multi_k=False) <= budget:
        return I
    # Otherwise pick the largest fitting divisor; 256-multiples first
    # (2x256x256 MXU on v6e/v7x), then 128-multiples (v5e-friendly).
    for align in (256, 128):
        cands = [c for c in range(align, I, align) if I % c == 0]
        for c in sorted(cands, reverse=True):
            if _working_set_bytes(tm, c, H, itm_x, itm_w, multi_k=True) <= budget:
                return c
    # Best effort: smallest legal tile.
    cands = [c for c in range(128, I, 128) if I % c == 0]
    return min(cands) if cands else I


@functools.partial(jax.jit, static_argnames=("tm", "ti"))
def adapter_forward(x, w_down, b_down, w_up, b_up, *, tm=512, ti=None):
    """Fused adapter forward: relu(x @ W_down + b_down) @ W_up + b_up.

    x:       [B, S, H]   activations in their stored dtype (cast in-kernel).
    w_down:  [H, I]      down-projection weight, stored [in, out].  Store it
                         (and w_up) in the desired MXU operand dtype ONCE,
                         outside the per-call path -- bf16 recommended on
                         v5e / v6e / v7x alike (f32 accumulation regardless).
    b_down:  [I]
    w_up:    [I, H]
    b_up:    [H]
    tm:      requested row tile (tokens per grid step); balanced/8-aligned
             internally, with >= 2 row tiles when M allows (v7x megacore).
    ti:      optional intermediate-dim tile (must divide I, multiple of 128);
             auto-selected from the VMEM budget when None.
    """
    B, S, H = x.shape
    I = w_down.shape[1]
    M = B * S
    out_dtype = x.dtype

    itm_x = jnp.dtype(x.dtype).itemsize
    itm_w = jnp.dtype(w_down.dtype).itemsize

    x2 = x.reshape(M, H)                                # no dtype cast here
    bd = b_down.reshape(1, I).astype(jnp.float32)
    bu = b_up.reshape(1, H).astype(jnp.float32)

    vmem_capacity = _vmem_capacity_bytes()
    budget = int(0.75 * vmem_capacity)                  # headroom for Mosaic scratch

    tm_eff, n_i = _pick_tm(M, tm)
    ti_eff = _pick_ti(tm_eff, H, I, itm_x, itm_w, budget, ti)
    n_k = I // ti_eff

    ws = _working_set_bytes(tm_eff, ti_eff, H, itm_x, itm_w, multi_k=(n_k > 1))
    vmem_limit = int(min(max(ws + (4 << 20), 32 << 20), vmem_capacity))

    weight_stream = n_i if n_k > 1 else 1               # weights re-streamed per row tile
    cost = pl.CostEstimate(
        flops=4 * M * H * I,
        transcendentals=0,
        bytes_accessed=(2 * M * H * itm_x
                        + weight_stream * 2 * H * I * itm_w
                        + 4 * (I + H)),
    )

    if n_k == 1:
        # Single-shot path: no accumulator scratch, weights single-buffered
        # (grid-invariant -> DMA'd once).
        grid_spec = pltpu.PrefetchScalarGridSpec(
            num_scalar_prefetch=0,
            grid=(n_i,),
            in_specs=[
                pl.BlockSpec((tm_eff, H), lambda i: (i, 0)),                 # x rows
                pl.BlockSpec((H, I), lambda i: (0, 0),
                             pipeline_mode=pl.Buffered(1)),                  # W_down
                pl.BlockSpec((1, I), lambda i: (0, 0),
                             pipeline_mode=pl.Buffered(1)),                  # b_down
                pl.BlockSpec((I, H), lambda i: (0, 0),
                             pipeline_mode=pl.Buffered(1)),                  # W_up
                pl.BlockSpec((1, H), lambda i: (0, 0),
                             pipeline_mode=pl.Buffered(1)),                  # b_up
            ],
            out_specs=pl.BlockSpec((tm_eff, H), lambda i: (i, 0)),
        )
        kernel = adapter_kernel_direct
        dim_sem = ("parallel",)
    else:
        # Reduction-tiled path over I with f32 accumulator scratch.
        grid_spec = pltpu.PrefetchScalarGridSpec(
            num_scalar_prefetch=0,
            grid=(n_i, n_k),
            in_specs=[
                pl.BlockSpec((tm_eff, H), lambda i, k: (i, 0)),              # x rows
                pl.BlockSpec((H, ti_eff), lambda i, k: (0, k)),              # W_down
                pl.BlockSpec((1, ti_eff), lambda i, k: (0, k)),              # b_down
                pl.BlockSpec((ti_eff, H), lambda i, k: (k, 0)),              # W_up
                pl.BlockSpec((1, H), lambda i, k: (0, 0),
                             pipeline_mode=pl.Buffered(1)),                  # b_up
            ],
            out_specs=pl.BlockSpec((tm_eff, H), lambda i, k: (i, 0)),
            scratch_shapes=[pltpu.VMEM((tm_eff, H), jnp.float32)],
        )
        kernel = adapter_kernel_acc
        dim_sem = ("parallel", "arbitrary")

    out2 = pl.pallas_call(
        kernel,
        out_shape=jax.ShapeDtypeStruct((M, H), out_dtype),
        grid_spec=grid_spec,
        compiler_params=pltpu.CompilerParams(
            dimension_semantics=dim_sem,
            vmem_limit_bytes=vmem_limit,
        ),
        cost_estimate=cost,
    )(x2, w_down, bd, w_up, bu)

    return out2.reshape(B, S, H)


# ----------------------------- init & demo ----------------------------------


def init_adapter_params(key, input_size, intermediate_size, dtype=jnp.float32):
    """Deterministic init matching nn.Linear's default U(-1/sqrt(fan_in), +)."""
    k1, k2, k3, k4 = jax.random.split(key, 4)
    bound_d = 1.0 / math.sqrt(input_size)
    bound_u = 1.0 / math.sqrt(intermediate_size)
    # Stored as [in, out] (i.e. transposed vs. PyTorch's [out, in]).
    w_down = jax.random.uniform(k1, (input_size, intermediate_size),
                                dtype, -bound_d, bound_d)
    b_down = jax.random.uniform(k2, (intermediate_size,), dtype,
                                -bound_d, bound_d)
    w_up = jax.random.uniform(k3, (intermediate_size, input_size),
                              dtype, -bound_u, bound_u)
    b_up = jax.random.uniform(k4, (input_size,), dtype, -bound_u, bound_u)
    return w_down, b_down, w_up, b_up


if __name__ == "__main__":
    key = jax.random.PRNGKey(0)
    kx1, kp1, kx2, kp2 = jax.random.split(key, 4)

    # Case 1: small module-consistent shapes, f32 weights, direct (n_k==1) path.
    B, S, H, I = 2, 8, 32, 16
    x = jax.random.normal(kx1, (B, S, H), dtype=jnp.float32)
    w_down, b_down, w_up, b_up = init_adapter_params(kp1, H, I)
    out = jax.block_until_ready(adapter_forward(x, w_down, b_down, w_up, b_up))
    ref = jnp.maximum(x @ w_down + b_down, 0.0) @ w_up + b_up
    assert out.shape == x.shape
    assert jnp.allclose(out, ref, atol=1e-5, rtol=1e-5), "f32 mismatch vs reference"

    # Case 2: ragged M (balanced row tiles, no padded step), reduction-tiled I
    # path, and bf16 weights pre-stored ONCE outside the per-call path
    # (activations stay f32 and are cast in-kernel).
    B2, S2, H2, I2 = 2, 136, 128, 256
    x2 = jax.random.normal(kx2, (B2, S2, H2), dtype=jnp.float32)
    wd2, bd2, wu2, bu2 = init_adapter_params(kp2, H2, I2)
    wd2_bf16 = wd2.astype(jnp.bfloat16)   # stored once, reused every call
    wu2_bf16 = wu2.astype(jnp.bfloat16)
    out2 = jax.block_until_ready(
        adapter_forward(x2, wd2_bf16, bd2, wu2_bf16, bu2, tm=512, ti=128))
    ref2 = jnp.maximum(x2 @ wd2 + bd2, 0.0) @ wu2 + bu2
    assert out2.shape == x2.shape
    # bf16 operands -> expected mixed-precision deviation from the f32 reference.
    assert jnp.allclose(out2, ref2, atol=5e-2, rtol=5e-2), "bf16 mismatch vs reference"

    print("KERNEL_OK")
</pallas_src>

<mosaic_0001>
module attributes {stable_mosaic.version = 11 : i64} {
  func.func @adapter_kernel_direct(%arg0: i32, %arg1: memref<8x32xf32, #tpu.memory_space<vmem>>, %arg2: memref<32x16xf32, #tpu.memory_space<vmem>>, %arg3: memref<1x16xf32, #tpu.memory_space<vmem>>, %arg4: memref<16x32xf32, #tpu.memory_space<vmem>>, %arg5: memref<1x32xf32, #tpu.memory_space<vmem>>, %arg6: memref<8x32xf32, #tpu.memory_space<vmem>>) attributes {dimension_semantics = [#tpu.dimension_semantics<parallel>], iteration_bounds = array<i64: 2>, scalar_prefetch = 0 : i64, scratch_operands = 0 : i64, tpu.core_type = #tpu.core_type<tc>, window_params = [{transform_indices = @transform_0, window_bounds = array<i64: 8, 32>}, {pipeline_mode = #tpu.pipeline_mode<synchronous>, transform_indices = @transform_1, window_bounds = array<i64: 32, 16>}, {pipeline_mode = #tpu.pipeline_mode<synchronous>, transform_indices = @transform_2, window_bounds = array<i64: 1, 16>}, {pipeline_mode = #tpu.pipeline_mode<synchronous>, transform_indices = @transform_3, window_bounds = array<i64: 16, 32>}, {pipeline_mode = #tpu.pipeline_mode<synchronous>, transform_indices = @transform_4, window_bounds = array<i64: 1, 32>}, {transform_indices = @transform_5, window_bounds = array<i64: 8, 32>}]} {
    %c0 = arith.constant 0 : index
    %c0_0 = arith.constant 0 : index
    %0 = vector.load %arg1[%c0, %c0_0] : memref<8x32xf32, #tpu.memory_space<vmem>>, vector<8x32xf32>
    %c0_1 = arith.constant 0 : index
    %c0_2 = arith.constant 0 : index
    %1 = vector.load %arg2[%c0_1, %c0_2] : memref<32x16xf32, #tpu.memory_space<vmem>>, vector<32x16xf32>
    %cst = arith.constant dense<0.000000e+00> : vector<8x16xf32>
    %2 = tpu.matmul %0, %1, %cst {dimension_numbers = #tpu.dot_dimension_numbers<[1], [0], [0], [1], [0, 0, 1, 1], [], []>} : vector<8x32xf32>, vector<32x16xf32>, vector<8x16xf32> -> vector<8x16xf32>
    %c0_3 = arith.constant 0 : index
    %c0_4 = arith.constant 0 : index
    %3 = vector.load %arg3[%c0_3, %c0_4] : memref<1x16xf32, #tpu.memory_space<vmem>>, vector<1x16xf32>
    %4 = vector.broadcast %3 : vector<1x16xf32> to vector<8x16xf32>
    %5 = arith.addf %2, %4 : vector<8x16xf32>
    %cst_5 = arith.constant 0.000000e+00 : f32
    %6 = vector.broadcast %cst_5 : f32 to vector<8x16xf32>
    %7 = arith.maximumf %5, %6 : vector<8x16xf32>
    %c0_6 = arith.constant 0 : index
    %c0_7 = arith.constant 0 : index
    %8 = vector.load %arg4[%c0_6, %c0_7] : memref<16x32xf32, #tpu.memory_space<vmem>>, vector<16x32xf32>
    %cst_8 = arith.constant dense<0.000000e+00> : vector<8x32xf32>
    %9 = tpu.matmul %7, %8, %cst_8 {dimension_numbers = #tpu.dot_dimension_numbers<[1], [0], [0], [1], [0, 0, 1, 1], [], []>} : vector<8x16xf32>, vector<16x32xf32>, vector<8x32xf32> -> vector<8x32xf32>
    %c0_9 = arith.constant 0 : index
    %c0_10 = arith.constant 0 : index
    %10 = vector.load %arg5[%c0_9, %c0_10] : memref<1x32xf32, #tpu.memory_space<vmem>>, vector<1x32xf32>
    %11 = vector.broadcast %10 : vector<1x32xf32> to vector<8x32xf32>
    %12 = arith.addf %9, %11 : vector<8x32xf32>
    %c0_11 = arith.constant 0 : index
    %c0_12 = arith.constant 0 : index
    %13 = vector.load %arg6[%c0_11, %c0_12] : memref<8x32xf32, #tpu.memory_space<vmem>>, vector<8x32xf32>
    tpu.vector_store %arg6[%c0_11, %c0_12], %12 {strides = array<i32>} : memref<8x32xf32, #tpu.memory_space<vmem>>, vector<8x32xf32>,
    return
  }
  func.func @transform_0(%arg0: i32) -> (i32, i32) {
    %c0_i32 = arith.constant 0 : i32
    %c0_i32_0 = arith.constant 0 : i32
    return %arg0, %c0_i32 : i32, i32
  }
  func.func @transform_1(%arg0: i32) -> (i32, i32) {
    %c0_i32 = arith.constant 0 : i32
    %c0_i32_0 = arith.constant 0 : i32
    %c0_i32_1 = arith.constant 0 : i32
    return %c0_i32, %c0_i32_0 : i32, i32
  }
  func.func @transform_2(%arg0: i32) -> (i32, i32) {
    %c0_i32 = arith.constant 0 : i32
    %c0_i32_0 = arith.constant 0 : i32
    %c0_i32_1 = arith.constant 0 : i32
    return %c0_i32, %c0_i32_0 : i32, i32
  }
  func.func @transform_3(%arg0: i32) -> (i32, i32) {
    %c0_i32 = arith.constant 0 : i32
    %c0_i32_0 = arith.constant 0 : i32
    %c0_i32_1 = arith.constant 0 : i32
    return %c0_i32, %c0_i32_0 : i32, i32
  }
  func.func @transform_4(%arg0: i32) -> (i32, i32) {
    %c0_i32 = arith.constant 0 : i32
    %c0_i32_0 = arith.constant 0 : i32
    %c0_i32_1 = arith.constant 0 : i32
    return %c0_i32, %c0_i32_0 : i32, i32
  }
  func.func @transform_5(%arg0: i32) -> (i32, i32) {
    %c0_i32 = arith.constant 0 : i32
    %c0_i32_0 = arith.constant 0 : i32
    return %arg0, %c0_i32 : i32, i32
  }
}

</mosaic_0001>

<bundles_post_ra>
// kernel: adapter_forward.1
= control target key start
LH: loop header
LB: loop body
LE: loop exit
PB: predicated region body
PF: predicated region fallthrough
CT: control target
= control target key end

     0   :  { %10 = vsyncpa [#allocation3], 0  ;;  %s779_s0 = inlined_call_operand.vmem [shape: f32[16,32], index: 0, kind: input, shape index: {}]   ;;  %s780_s1 = inlined_call_operand.vmem [shape: f32[32,16], index: 1, kind: input, shape index: {}]   ;;  %s781_s2 = inlined_call_operand.vmem [shape: f32[1,16], index: 2, kind: input, shape index: {}]   ;;  %s782_s3 = inlined_call_operand.vmem [shape: f32[16,32], index: 3, kind: input, shape index: {}]   ;;  %s783_s4 = inlined_call_operand.vmem [shape: f32[1,32], index: 4, kind: input, shape index: {}]   ;;  %s784_s5 = inlined_call_operand.hbm [shape: f32[16,32], index: 5, kind: output, shape index: {}]  }
   0x1   :  { %12 = vsyncpa [#allocation3 + $0x1], 0  ;;  %s653_s18 = smov 0   ;;  %s655_s19 = smov 0  }
   0x2   :  { %s657_s20 = smov 0   ;;  %s659_s21 = smov 0  }
   0x3 LB: > { %s674_s22 = sadd.s32 4294967295, %s617_s21   ;;  %s464_s23 = sadd.s32 4294967294, %s617_s21   ;;  %s617_s21 = sphi %s659_s21, %s790_s21   ;;  %s613_s20 = sphi %s657_s20, %s789_s20   ;;  %s609_s19 = sphi %s655_s19, %s788_s19   ;;  %s605_s18 = sphi %s653_s18, %s787_s18  }
   0x4   : > { %s678_s24 = sadd.s32 1, %s617_s21   ;;  %s135_s25 = sadd.s32 1, %s613_s20 }
   0x5   : > { %s132_s26 = ssub.s32 %s617_s21, %s678_s24  ;;  %p145_p0 = scmp.ne.s32.totalorder %s613_s20, %s609_s19 }
   0x6   : > { %p133_p1 = scmp.eq.s32.totalorder %s132_s26, 0  ;;  %p146_p2 = scmp.eq.s32.totalorder %s674_s22, 1 }
   0x7   : > { %p151_p3 = scmp.ne.s32.totalorder %s609_s19, %s605_s18  ;;  %p152_p4 = scmp.eq.s32.totalorder %s464_s23, 1 }
   0x8   : > { %s689_s27 = scalar_select %p133_p1, %s613_s20, %s135_s25  }
   0x9   : > { %p691_p5 = por %p146_p2, %p145_p0  ;;  %p695_p6 = por %p152_p4, %p151_p3 }
   0xa   : > { %p467_p7 = scmp.ge.s32.totalorder %s617_s21, 1  ;;  %p189_p8 = scmp.lt.s32.totalorder %s617_s21, 3 }
   0xc   : > { %p190_p9 = pnand %p467_p7, %p189_p8 }
   0xd   : > { %v221_v0 = vld [vmem:[%s780_s1] sm:$0xff] (!%p190_p9)  ;;  %v222_v1 = vld [vmem:[%s780_s1 + $0x8] sm:$0xff] (!%p190_p9)  ;;  %v223_v2 = vld [vmem:[%s780_s1 + $0x10] sm:$0xff] (!%p190_p9)  ;;  %v619_v3 = vmov (!%p190_p9), 0.0|0.0   ;;  %vm620_vm0 = vmmov (!%p190_p9), 0   ;;  %v621_v6 = vmov (!%p190_p9), 0.0  }
   0xe   : > { %193 = sbr.rel (%p190_p9) target bundleno = 470 (0x1d6), region = 40  ;;  %504 = vmatprep.subr.bf16.mxu0 (!%p190_p9), %v619_v3  ;;  %v505_v4 = vpack.c.bf16 (!%p190_p9), %v222_v1, %v221_v0  ;;  %v224_v5 = vld [vmem:[%s780_s1 + $0x18] sm:$0xff] (!%p190_p9)  ;;  %494 = vmatprep.mubr.msk.f32.mxu0 (!%p190_p9), %vm620_vm0, %v621_v6  ;;  %p216_p10 = scmp.lt.s32.totalorder (!%p190_p9), %s674_s22, 1  ;;  %vm232_vm1 = vcmask (!%p190_p9), 261120   ;;  %v307_v9 = vld [vmem:[%s782_s3] sm:$0xff] (!%p190_p9)  ;;  %v308_v10 = vld [vmem:[%s782_s3 + $0x8] sm:$0xff] (!%p190_p9) }
   0xf   : > { %510 = vmatprep.subr.bf16.mxu1 (!%p190_p9), %v619_v3  ;;  %501 = vmatprep.mubr.msk.f32.mxu1 (!%p190_p9), %vm620_vm0, %v621_v6  ;;  %v508_v7 = vpack.c.bf16 (!%p190_p9), %v224_v5, %v223_v2  ;;  %v511_v11 = vpack.c.bf16 (!%p190_p9), %v308_v10, %v307_v9  ;;  %v470_v12 = vld [vmem:[%s781_s2] ss:$0 sm:$0xff] (!%p190_p9)  ;;  %vm316_vm2 = vcmask (!%p190_p9), 130048   ;;  %s213_s8 = sand.u32 (!%p190_p9), 1, %s609_s19   ;;  %s475_s12 = sshll.u32 (!%p190_p9), %s674_s22, 7 }
  0x10   : > { %506 = vmatpush3.bf16.msra.mxu0 (!%p190_p9), %v505_v4  ;;  %s468_s9 = sshll.u32 (!%p190_p9), %s213_s8, 3  ;;  %v472_v17 = vld [vmem:[%s783_s4] ss:$0 sm:$0xff] (!%p190_p9)  ;;  %s392_s23 = scalar_lea.sflag (!%p190_p9), [#allocation3], %s213_s8 }
  0x11   : > { %507 = vmatprep.subr.bf16.mxu0 (!%p190_p9), %v619_v3  ;;  %512 = vmatpush3.bf16.msra.mxu1 (!%p190_p9), %v511_v11 }
  0x14   : > { %509 = vmatpush3.bf16.msra.mxu0 (!%p190_p9), %v508_v7 }
  0x15   : > { %s217_s13 = scalar_select %p216_p10, %s674_s22, 1 }
  0x16   : > { %s622_s22 = smov [#allocation2]  }
  0x17   : > { %s469_s14 = sshll.u32 %s217_s13, 3  ;;  %s215_s13 = scalar_lea.vmem [#allocation2], %s468_s9 }
  0x18   : > { %s219_s17 = scalar_lea.vmem %s779_s0, %s469_s14  ;;  %s405_s14 = sshll.u32 %s215_s13, 4  ;;  %s738_s14 = int_to_ptr.vmem [resolvable:$true] %s405_s14 }
  0x19   : > { %v220_v8 = vld [vmem:[%s219_s17] sm:$0xff]  ;;  %s736_s17 = scalar_lea.hbm %s784_s5, %s475_s12  ;;  %s555_s25 = scalar_lea.vmem %s738_s14, 128 }
  0x1a   : > { %495 = vmatmul.mubr.msk.f32.vlgmr.msra.gmra.mrb[0].mxu0 %vm232_vm1, %v220_v8  ;;  %p556_p11 = scmp.ne.s32.totalorder %s738_s14, %s555_s25  ;;  %s559_s26 = sshll.u32 %s622_s22, 4  ;;  %s560_s26 = int_to_ptr.vmem [resolvable:$false] %s559_s26 }
  0x1b   : > { %s561_s30 = scalar_lea.vmem %s560_s26, 256  ;;  %p562_p0 = scmp.lt.s32.totalorder %s738_s14, %s560_s26 }
  0x1c   : > { %p557_p12 = pnand %p556_p11, %p691_p5  ;;  %p563_p1 = scmp.lt.s32.totalorder %s561_s30, %s555_s25 }
  0x1e   : > { %p558_p13 = pneg %p557_p12  ;;  %p564_p2 = por %p563_p1, %p562_p0 }
  0x20   : > { %p565_p3 = pnand %p564_p2, %p558_p13 }
  0xed   : > { %v302_v13 = vpop.f32.mrb[0].mxu0 }
  0xee   : > { %v303_v14 = vadd.f32 %v470_v12, %v302_v13  ;;  %v496_v15 = vpop.f32.mrb[1].mxu0 }
  0xf0   : > { %v306_v16 = vmax.f32 %v303_v14, 0.0 }
  0xf2   : > { %502 = vmatmul.mubr.msk.f32.vlgmr.msra.gmra.mrb[0].mxu1 %vm316_vm2, %v306_v16 }
 0x1c5   : > { %v386_v18 = vpop.f32.mrb[0].mxu1 }
 0x1c6   : > { %v387_v19 = vadd.f32 %v472_v17, %v386_v18  ;;  %v503_v20 = vpop.f32.mrb[1].mxu1 }
 0x1c8   : > { %390 = vst.msk [vmem:[%s215_s13] sm:$0xff] %vm232_vm1, %v387_v19 }
 0x1c9   : > { %568 = shalt.err (!%p565_p3)
}
 0x1ca   : > { %s569_s6 = scalar_lea.hbm %s736_s17, 128  ;;  %s573_s9 = scalar_lea.hbm %s784_s5, 256 }
 0x1cb   : > { %p570_p4 = scmp.ne.s32.totalorder %s736_s17, %s569_s6  ;;  %p574_p9 = scmp.lt.u32.totalorder %s736_s17, %s784_s5 }
 0x1cc   : > { %p575_p10 = scmp.lt.u32.totalorder %s573_s9, %s569_s6  ;;  %p577_p12 = scmp.lt.u32.totalorder %s569_s6, %s736_s17 }
 0x1cd   : > { %p571_p7 = pnand %p570_p4, %p691_p5 }
 0x1ce   : > { %p576_p11 = por %p575_p10, %p574_p9 }
 0x1cf   : > { %p572_p8 = pneg %p571_p7 }
 0x1d0   : > { %p578_p13 = por %p577_p12, %p576_p11 }
 0x1d2   : > { %p579_p0 = pnand %p578_p13, %p572_p8 }
 0x1d4   : > { %582 = shalt.err (!%p579_p0)
}
 0x1d5   : > { %513 = dma.vmem_to_hbm [thread:$0]  (%p691_p5), %s738_s14, 128, %s736_s17, %s392_s23  }
 0x1d6 PF: > { %p519_p1 = scmp.ge.s32.totalorder %s617_s21, 2  ;;  %s417_s12 = sand.u32 1, %s605_s18  }
 0x1d7   : > { %s418_s13 = scalar_lea.sflag [#allocation3], %s417_s12 }
 0x1d8   : > { %p516_p2 = pnand %p519_p1, %p695_p6 }
 0x1da   : > { %600 = dma.done.wait (!%p516_p2), %s418_s13, 128  }
 0x1db   : > { %602 = vsyncadd (!%p516_p2), %s418_s13, 4294967168  ;;  %p15_p3 = scmp.ge.s32.totalorder %s678_s24, 4   ;;  %s787_s18 = smov %s609_s19 }
 0x1dc   : > { %s788_s19 = smov %s613_s20  ;;  %s789_s20 = smov %s689_s27 }
 0x1dd   : > { %s790_s21 = smov %s678_s24  ;;  %17 = sbr.rel (!%p15_p3) target bundleno = 3 (0x3), region = 75 }
 0x1e4   :  { %423 = vsyncpa [#allocation3], 1 }
 0x1e5   :  { %425 = vsyncpa [#allocation3 + $0x1], 1 }

</bundles_post_ra>
